<compile_context>
chip_gen: v5e
topology: v5e:2x2
jax: 0.10.0
libtpu: 0.0.40
codegen_flags: <defaults>
</compile_context>

<pallas_src>
import jax
import jax.numpy as jnp
from jax.experimental import pallas as pl
from jax.experimental.pallas import tpu as pltpu


def _round_up(x: int, m: int) -> int:
    return ((x + m - 1) // m) * m


def _by_pat_kernel(x_ref, w_ref, out_ref):
    # out[b, (j,k)] = sum_c X[b, c] * W[c, (j,k)]  -- one MXU GEMM per tile.
    out_ref[...] = jnp.dot(
        x_ref[...], w_ref[...], preferred_element_type=jnp.float32
    ).astype(out_ref.dtype)


def by_pat_tensor_fact(idx_pat, params, *, block_b: int = 8192,
                       out_dtype=jnp.float32):
    """Forward pass of By_pat_tensor_fact.

    The embedding-row gather and the batch-independent factor
    W = [M_flat ; beta_u @ M_flat] are plain-JAX parameter preprocessing;
    the batch-tiled GEMM hot path runs in Pallas.
    """
    pat_lat = params["pat_lat"].astype(jnp.float32)            # [n_pat, l_dim]
    meas_lat = params["meas_lat"].astype(jnp.float32)          # [n_meas, l_dim]
    time_lat = params["time_lat"].astype(jnp.float32)          # [n_t, l_dim]
    beta_u = params["beta_u"].astype(jnp.float32)              # [n_u, l_dim]
    beta_w = params["beta_w"].astype(jnp.float32)              # [n_w(=1), l_dim]
    cov_w_fixed = params["cov_w_fixed"].astype(jnp.float32)    # [n_t, 1]
    covariates_u = params["covariates_u"].astype(jnp.float32)  # [n_pat, n_u]

    B = idx_pat.shape[0]
    n_meas, l_dim = meas_lat.shape
    n_t = time_lat.shape[0]
    n_u = covariates_u.shape[1]
    k_dim = l_dim + n_u
    n_out = n_meas * n_t

    # --- Batch-independent factor W = [M_flat ; beta_u @ M_flat]. -----------
    t = time_lat + cov_w_fixed @ beta_w                         # [n_t, l_dim]
    m = meas_lat[:, None, :] * t[None, :, :]                    # [n_meas, n_t, l_dim]
    m_flat = m.reshape(n_out, l_dim).T                          # [l_dim, n_out]
    w = jnp.concatenate([m_flat, beta_u @ m_flat], axis=0)      # [k_dim, n_out]

    # --- Fused gather: one embedding lookup into [B, l_dim + n_u]. ----------
    # (Kept in XLA on purpose: per-row kernel-side DMAs of 8-16 B rows would be
    #  a descriptor-bound regression; this gather is negligible traffic.)
    fused_table = jnp.concatenate([pat_lat, covariates_u], axis=1)  # [n_pat, k_dim]
    x = fused_table[idx_pat]                                        # [B, k_dim]

    # --- Batch tiling: minimal padding (<= 8 rows per grid step). -----------
    num_blocks = max(1, pl.cdiv(B, max(block_b, 8)))
    if num_blocks > 1 and num_blocks % 2 == 1:
        num_blocks += 1          # even grid -> both v7x TCs get work
    block_b_eff = _round_up(pl.cdiv(B, num_blocks), 8)
    B_pad = num_blocks * block_b_eff
    if B_pad != B:
        x = jnp.pad(x, ((0, B_pad - B), (0, 0)))

    out_flat = pl.pallas_call(
        _by_pat_kernel,
        out_shape=jax.ShapeDtypeStruct((B_pad, n_out), out_dtype),
        grid_spec=pltpu.PrefetchScalarGridSpec(
            num_scalar_prefetch=0,
            grid=(num_blocks,),
            in_specs=[
                # X tile: last dim == full array dim (k_dim), legal BlockSpec.
                pl.BlockSpec((block_b_eff, k_dim), lambda i: (i, 0)),
                # W: tiny, constant index_map -> resident across grid steps.
                pl.BlockSpec((k_dim, n_out), lambda i: (0, 0)),
            ],
            # Output tile: full last dim -> no pad/slice pass after the kernel.
            out_specs=pl.BlockSpec((block_b_eff, n_out), lambda i: (i, 0)),
        ),
        compiler_params=pltpu.CompilerParams(
            dimension_semantics=("parallel",),
            vmem_limit_bytes=32 * 1024 * 1024,
        ),
    )(x, w)

    if B_pad != B:
        out_flat = out_flat[:B]
    return out_flat.reshape(B, n_meas, n_t)


def make_params(key, n_pat=10, n_meas=5, n_t=25, l_dim=2, n_u=2, n_w=1):
    ks = jax.random.split(key, 6)
    return dict(
        pat_lat=0.01 * jax.random.normal(ks[0], (n_pat, l_dim), jnp.float32),
        meas_lat=0.01 * jax.random.normal(ks[1], (n_meas, l_dim), jnp.float32),
        time_lat=0.005 * jax.random.normal(ks[2], (n_t, l_dim), jnp.float32),
        beta_u=jax.random.normal(ks[3], (n_u, l_dim), jnp.float32),
        beta_w=jax.random.normal(ks[4], (n_w, l_dim), jnp.float32),
        cov_w_fixed=jnp.arange(n_t, dtype=jnp.float32)[:, None],
        covariates_u=jax.random.normal(ks[5], (n_pat, n_u), jnp.float32),
    )


def _reference(idx_pat, p):
    a = p["pat_lat"][idx_pat] + p["covariates_u"][idx_pat] @ p["beta_u"]
    t = p["time_lat"] + p["cov_w_fixed"] @ p["beta_w"]
    m = jnp.einsum("il,jl->ijl", p["meas_lat"], t)
    return jnp.einsum("il,jkl->ijk", a, m)


if __name__ == "__main__":
    key = jax.random.PRNGKey(0)
    pkey, ikey = jax.random.split(key)
    # TODO(synk): semantics only shape-consistent for n_w == 1 (inherited from
    # the PyTorch module's cov_w_fixed [n_t, 1] @ beta_w [n_w, l_dim]).
    params = make_params(pkey, n_pat=10, n_meas=5, n_t=25, l_dim=2, n_u=2, n_w=1)

    B = 8
    idx_pat = jax.random.randint(ikey, (B,), 0, 10, dtype=jnp.int32)

    out = by_pat_tensor_fact(idx_pat, params)
    out = jax.block_until_ready(out)

    ref = _reference(idx_pat, params)
    assert out.shape == (B, 5, 25), out.shape
    assert jnp.allclose(out, ref, atol=1e-5, rtol=1e-5), "mismatch vs reference"
    print("KERNEL_OK")
</pallas_src>

<mosaic_0001>
module attributes {stable_mosaic.version = 11 : i64} {
  func.func @_by_pat_kernel(%arg0: i32, %arg1: memref<8x4xf32, #tpu.memory_space<vmem>>, %arg2: memref<4x125xf32, #tpu.memory_space<vmem>>, %arg3: memref<8x125xf32, #tpu.memory_space<vmem>>) attributes {dimension_semantics = [#tpu.dimension_semantics<parallel>], iteration_bounds = array<i64: 1>, scalar_prefetch = 0 : i64, scratch_operands = 0 : i64, tpu.core_type = #tpu.core_type<tc>, window_params = [{transform_indices = @transform_0, window_bounds = array<i64: 8, 4>}, {pipeline_mode = #tpu.pipeline_mode<synchronous>, transform_indices = @transform_1, window_bounds = array<i64: 4, 125>}, {transform_indices = @transform_2, window_bounds = array<i64: 8, 125>}]} {
    %c0 = arith.constant 0 : index
    %c0_0 = arith.constant 0 : index
    %0 = vector.load %arg1[%c0, %c0_0] : memref<8x4xf32, #tpu.memory_space<vmem>>, vector<8x4xf32>
    %c0_1 = arith.constant 0 : index
    %c0_2 = arith.constant 0 : index
    %1 = vector.load %arg2[%c0_1, %c0_2] : memref<4x125xf32, #tpu.memory_space<vmem>>, vector<4x125xf32>
    %cst = arith.constant dense<0.000000e+00> : vector<8x125xf32>
    %2 = tpu.matmul %0, %1, %cst {dimension_numbers = #tpu.dot_dimension_numbers<[1], [0], [0], [1], [0, 0, 1, 1], [], []>} : vector<8x4xf32>, vector<4x125xf32>, vector<8x125xf32> -> vector<8x125xf32>
    %c0_3 = arith.constant 0 : index
    %c0_4 = arith.constant 0 : index
    %3 = vector.load %arg3[%c0_3, %c0_4] : memref<8x125xf32, #tpu.memory_space<vmem>>, vector<8x125xf32>
    tpu.vector_store %arg3[%c0_3, %c0_4], %2 {strides = array<i32>} : memref<8x125xf32, #tpu.memory_space<vmem>>, vector<8x125xf32>,
    return
  }
  func.func @transform_0(%arg0: i32) -> (i32, i32) {
    %c0_i32 = arith.constant 0 : i32
    %c0_i32_0 = arith.constant 0 : i32
    return %arg0, %c0_i32 : i32, i32
  }
  func.func @transform_1(%arg0: i32) -> (i32, i32) {
    %c0_i32 = arith.constant 0 : i32
    %c0_i32_0 = arith.constant 0 : i32
    %c0_i32_1 = arith.constant 0 : i32
    return %c0_i32, %c0_i32_0 : i32, i32
  }
  func.func @transform_2(%arg0: i32) -> (i32, i32) {
    %c0_i32 = arith.constant 0 : i32
    %c0_i32_0 = arith.constant 0 : i32
    return %arg0, %c0_i32 : i32, i32
  }
}

</mosaic_0001>

<bundles_post_ra>
// kernel: tpu_custom_call.1
= control target key start
LH: loop header
LB: loop body
LE: loop exit
PB: predicated region body
PF: predicated region fallthrough
CT: control target
= control target key end

     0   :  { %vm18_vm0 = vcmask 1043456   ;;  %vm14_vm1 = vcmask 31744   ;;  %s114_s0 = inlined_call_operand.vmem [shape: f32[8,4], index: 0, kind: input, shape index: {}]   ;;  %s115_s1 = inlined_call_operand.vmem [shape: f32[4,125], index: 1, kind: input, shape index: {}]   ;;  %s116_s2 = inlined_call_operand.hbm [shape: f32[8,125], index: 2, kind: output, shape index: {}]  }
   0x1   :  { %v13_v0 = vld [vmem:[%s115_s1] sm:$0xf] }
   0x2   :  { %v12_v1 = vld [vmem:[%s114_s0] sm:$0xff]  ;;  %60 = vmatpush.msk.msra.mxu0 %vm18_vm0, %v13_v0 }
   0x3   :  { %7 = vsyncpa [#allocation3], 0  ;;  %61 = vmatmul.msk.f32.vlgmr.msra.gmra.mxu0 %vm14_vm1, %v12_v1  ;;  %s89_s13 = smov [#allocation2]   ;;  %s51_s17 = sshll.u32 %s116_s2, 4  ;;  %vm42_vm2 = vcmask 1022976   ;;  %s52_s17 = int_to_ptr.hbm [resolvable:$true] %s51_s17 }
   0x4   :  { %s49_s14 = sshll.u32 %s89_s13, 4  ;;  %s50_s14 = int_to_ptr.vmem [resolvable:$true] %s49_s14 }
  0x80   :  { %v39_v2 = vpop.f32.mrf.mxu0 }
  0x81   :  { %43 = vst.msk [vmem:[#allocation2] sm:$0xff] %vm42_vm2, %v39_v2 }
  0x82   :  { %54 = dma.vmem_to_hbm [thread:$0]  %s50_s14, 128, %s52_s17, [#allocation3]  }
  0x83   :  { %87 = dma.done.wait [#allocation3], 128  }
  0x84   :  { %88 = vsyncadd [#allocation3], 4294967168 }
  0x85   :  { %59 = vsyncpa [#allocation3], 1 }

</bundles_post_ra>
